<compile_context>
chip_gen: v6e
topology: v6e:2x2x1
jax: 0.10.0
libtpu: 0.0.40
codegen_flags: <defaults>
</compile_context>

<pallas_src>
import jax
import jax.numpy as jnp
from jax import lax
from jax.experimental import pallas as pl
from jax.experimental.pallas import tpu as pltpu
from jax.scipy.special import gammaln, multigammaln


# ----------------------------------------------------------------------------
# Pallas kernel: fused right/left-split NIW sufficient statistics
# ----------------------------------------------------------------------------
def _suff_stats_kernel(xin_ref, out_ref):
    # xin_ref : (B, D+1, Nt) f32; rows 0..D-1 = features (lane axis = N),
    #           row D = split weight z in [0,1].
    # out_ref : (B, 2*(D+1), D+1) f32, resident across the N grid axis:
    #   out[:, :D+1]  = [[S_r, sum_r], [sum_r^T, N_r]]   (weights z)
    #   out[:, D+1:]  = [[S_l, sum_l], [sum_l^T, N_l]]   (weights 1-z, direct)
    @pl.when(pl.program_id(1) == 0)
    def _():
        out_ref[...] = jnp.zeros_like(out_ref)

    xin = xin_ref[...]                                    # (B, D+1, Nt)
    d1 = xin.shape[1]                                     # D + 1 (static)
    x = xin[:, : d1 - 1, :]                               # (B, D, Nt)
    z = xin[:, d1 - 1:, :]                                # (B, 1, Nt)
    xa = jnp.concatenate([x, jnp.ones_like(z)], axis=1)   # (B, D+1, Nt)
    lhs = jnp.concatenate([xa * z, xa * (1.0 - z)], axis=1)   # (B, 2(D+1), Nt)

    # Single batched MXU Gram per step; contraction over the lane axis N.
    out_ref[...] += jnp.einsum('brn,bcn->brc', lhs, xa,
                               preferred_element_type=jnp.float32)


# ----------------------------------------------------------------------------
# Tile selection (padded + double-buffered VMEM footprint model)
# ----------------------------------------------------------------------------
def _pad8(v):
    return -(-int(v) // 8) * 8


def _pad128(v):
    return -(-int(v) // 128) * 128


def _tpu_limits():
    """(per-core VMEM bytes, #TensorCores per chip) — best effort, safe fallbacks."""
    kind = ""
    try:
        kind = jax.devices()[0].device_kind.lower()
    except Exception:
        pass
    vmem = None
    try:
        vmem = int(pltpu.get_tpu_info().vmem_capacity_bytes)
    except Exception:
        vmem = None
    if vmem is None:
        if "v2" in kind or "v3" in kind:
            vmem = 16 << 20
        elif "v7" in kind or "7x" in kind:
            vmem = 64 << 20
        elif kind:
            vmem = 128 << 20
        else:
            vmem = 64 << 20                 # unknown -> assume the smallest VMEM
    single_tc = any(t in kind for t in ("lite", "v5e", "v6e"))
    n_tc = 1 if single_tc else 2            # unknown -> assume megacore (only caps b_tile)
    return vmem, n_tc


def _choose_tiles(bs, N, D, vmem_bytes, n_tc):
    rows_in = _pad8(D + 1)                              # sublane-padded input rows
    # Generous bound on live in-kernel temporaries (x/z slices, xa, the two
    # weighted copies, fused LHS) — Mosaic spills large vector values to VMEM.
    rows_tmp = 4 * _pad8(D + 1) + 2 * _pad8(2 * (D + 1))
    lane_bytes = 4 * (2 * rows_in + rows_tmp)           # per lane, per batch row (inputs 2x buffered)
    out_bytes = 4 * 3 * _pad8(2 * (D + 1)) * _pad128(D + 1)
    budget = (55 * vmem_bytes) // 100                   # headroom for Mosaic internals

    def b_cap_for(n_tile):
        return max(1, budget // (lane_bytes * n_tile + out_bytes))

    # N tile: full N unless that forces b_tile below ~8; then the largest
    # multiple-of-128 divisor of N at or below ~16K lanes (MiB-scale DMA blocks
    # that still fit v7x's 64 MiB VMEM).
    n_tile = N
    if N % 128 == 0 and b_cap_for(N) < min(bs, 8):
        cand = (min(N, 16 * 1024) // 128) * 128
        while cand >= 128 and N % cand:
            cand -= 128
        if cand >= 128:
            n_tile = cand

    cap = min(bs, b_cap_for(n_tile))
    if n_tc > 1:
        # >= 2 grid steps per TensorCore: both cores get work and each keeps
        # its input pipeline double-buffered.  (No cap on single-TC chips.)
        cap = min(cap, max(1, -(-bs // (2 * n_tc))))

    # Prefer a b_tile that divides bs (no padding, no partial blocks); fall
    # back to a ceil-grid (partial, discarded last block) if the best divisor
    # is much smaller than the cap.
    div = 1
    for d in range(int(cap), 0, -1):
        if bs % d == 0:
            div = d
            break
    b_tile = div if (div * 2 >= cap or div == bs) else int(cap)
    return int(max(1, b_tile)), int(n_tile)


# ----------------------------------------------------------------------------
# Wrapper around pallas_call
# ----------------------------------------------------------------------------
def _batch_suff_stats(x, pred_labels, b_tile=None, n_tile=None):
    """x: (bs, N, D), pred_labels: (bs, N) -> (N_r, N_l, sum_r, sum_l, S_r, S_l)."""
    bs, N, D = x.shape
    x = x.astype(jnp.float32)
    z = pred_labels.astype(jnp.float32)

    # Single fused relayout pass: lane-dense features with the split weights
    # appended as one extra row.  No ones row in HBM, no separate z operand,
    # no batch padding.
    xin = jnp.concatenate([jnp.swapaxes(x, 1, 2), z[:, None, :]], axis=1)  # (bs, D+1, N)

    vmem_bytes, n_tc = _tpu_limits()
    auto_b, auto_n = _choose_tiles(bs, N, D, vmem_bytes, n_tc)
    b_tile = auto_b if b_tile is None else int(min(max(1, b_tile), bs))
    n_tile = auto_n if n_tile is None else int(n_tile)
    if N % n_tile:
        n_tile = N                        # last-dim block must divide N or equal it

    grid_b = -(-bs // b_tile)
    grid_n = N // n_tile
    d1 = D + 1

    out = pl.pallas_call(
        _suff_stats_kernel,
        out_shape=jax.ShapeDtypeStruct((bs, 2 * d1, d1), jnp.float32),
        grid=(grid_b, grid_n),
        in_specs=[pl.BlockSpec((b_tile, d1, n_tile), lambda b, n: (b, 0, n))],
        out_specs=pl.BlockSpec((b_tile, 2 * d1, d1), lambda b, n: (b, 0, 0)),
        compiler_params=pltpu.CompilerParams(
            dimension_semantics=("parallel", "arbitrary"),
            vmem_limit_bytes=int(0.85 * vmem_bytes),
        ),
    )(xin)

    g_r, g_l = out[:, :d1, :], out[:, d1:, :]
    S_r, sum_r, N_r = g_r[:, :D, :D], g_r[:, :D, D], g_r[:, D, D]
    S_l, sum_l, N_l = g_l[:, :D, :D], g_l[:, :D, D], g_l[:, D, D]
    return N_r, N_l, sum_r, sum_l, S_r, S_l


# ----------------------------------------------------------------------------
# Plain-JAX glue: NIW posterior update + marginal log-likelihood + Hastings HR
# ----------------------------------------------------------------------------
def _update_posterior(k0, v0, mu0, psi0, Nb, sum_b, S_b):
    # mirrors niw_hyperparams.update_posterior
    k = k0 + Nb                                            # (bs,)
    v = v0 + Nb                                            # (bs,)
    mu = (mu0 * k0 + sum_b) / k[:, None]                   # (bs, D)
    psi = (v0 * psi0[None, :, :]
           + k0 * (mu0.T @ mu0)[None, :, :]
           - k[:, None, None] * (mu[:, :, None] * mu[:, None, :])
           + S_b) / v[:, None, None]                       # (bs, D, D)
    return k, v, mu, psi


def _log_marginal_likelihood(k0, v0, psi0, kp, vp, psip, Nb, D):
    # mirrors batch_log_marginal_likelihood
    logpi = jnp.log(jnp.asarray(jnp.pi, jnp.float32))
    logdet_prior = jnp.linalg.slogdet(psi0)[1]
    logdet_post = jnp.linalg.slogdet(psip)[1]
    ll = (-Nb * D * 0.5 * logpi
          + multigammaln(vp / 2.0, D) - multigammaln(v0 / 2.0, D)
          + v0 / 2.0 * (D * jnp.log(v0) + logdet_prior)
          - vp / 2.0 * (D * jnp.log(vp) + logdet_post)
          + D / 2.0 * jnp.log(k0 / kp))
    return ll


def hastings_ratio_loss(x, pred_labels, k0, v0, mu0, psi0, alpha):
    """Forward pass of HastingsRatioLoss: loss = -mean(log Hastings ratio)."""
    bs, N, D = x.shape
    Nr, Nl, sum_r, sum_l, S_r, S_l = _batch_suff_stats(x, pred_labels)

    kr, vr, mur, psir = _update_posterior(k0, v0, mu0, psi0, Nr, sum_r, S_r)
    kl, vl, mul, psil = _update_posterior(k0, v0, mu0, psi0, Nl, sum_l, S_l)

    ll_r = _log_marginal_likelihood(k0, v0, psi0, kr, vr, psir, Nr, D)
    ll_l = _log_marginal_likelihood(k0, v0, psi0, kl, vl, psil, Nl, D)

    # NOTE: like the torch reference, an empty split (N_r==0 or N_l==0) yields
    # lgamma(0)=+inf; degenerate labelings are not clamped to preserve semantics.
    log_hr = (jnp.log(jnp.asarray(alpha, jnp.float32))
              + gammaln(Nr) + ll_r
              + gammaln(Nl) + ll_l)
    return -jnp.mean(log_hr)


# ----------------------------------------------------------------------------
# Pure-JAX reference (mirrors the torch module directly) for validation
# ----------------------------------------------------------------------------
def _reference_loss(x, pred_labels, k0, v0, mu0, psi0, alpha):
    x = x.astype(jnp.float32)
    z = pred_labels.astype(jnp.float32)
    bs, N, D = x.shape
    hi = lax.Precision.HIGHEST

    def stats(w):                       # w: (bs, N, 1)
        Nb = jnp.sum(w[..., 0], axis=1)
        s = jnp.sum(x * w, axis=1)
        S = jnp.einsum('bnd,bne->bde', x * w, x, precision=hi)
        return Nb, s, S

    Nr, sr, Sr = stats(z[..., None])
    Nl, sl, Sl = stats(1.0 - z[..., None])
    kr, vr, _, psir = _update_posterior(k0, v0, mu0, psi0, Nr, sr, Sr)
    kl, vl, _, psil = _update_posterior(k0, v0, mu0, psi0, Nl, sl, Sl)
    ll_r = _log_marginal_likelihood(k0, v0, psi0, kr, vr, psir, Nr, D)
    ll_l = _log_marginal_likelihood(k0, v0, psi0, kl, vl, psil, Nl, D)
    log_hr = (jnp.log(jnp.asarray(alpha, jnp.float32))
              + gammaln(Nr) + ll_r + gammaln(Nl) + ll_l)
    return -jnp.mean(log_hr)


# ----------------------------------------------------------------------------
if __name__ == "__main__":
    bs, N, D = 2, 128, 4
    alpha = 10.0

    # deterministic NIW prior parameters (module __init__ shapes)
    k0 = jnp.float32(1.0)                     # scalar kappa
    v0 = jnp.float32(D + 2.0)                 # scalar dof (> D-1)
    mu0 = jnp.full((1, D), 0.1, jnp.float32)  # (1, D) prior mean
    psi0 = jnp.eye(D, dtype=jnp.float32)      # (D, D) prior scale matrix

    key = jax.random.PRNGKey(0)
    kx, kz = jax.random.split(key)
    x = jax.random.normal(kx, (bs, N, D), dtype=jnp.float32)
    pred_labels = (jax.random.uniform(kz, (bs, N)) > 0.5).astype(jnp.float32)

    loss = jax.jit(hastings_ratio_loss)(x, pred_labels, k0, v0, mu0, psi0, alpha)
    loss = jax.block_until_ready(loss)
    assert jnp.isfinite(loss), "loss is not finite"

    ref = jax.block_until_ready(
        _reference_loss(x, pred_labels, k0, v0, mu0, psi0, alpha))
    assert jnp.allclose(loss, ref, rtol=2e-3, atol=2e-3), (loss, ref)

    print("KERNEL_OK")
</pallas_src>

<mosaic_0001>
module attributes {stable_mosaic.version = 11 : i64} {
  func.func @_suff_stats_kernel(%arg0: i32, %arg1: i32, %arg2: memref<1x5x128xf32, #tpu.memory_space<vmem>>, %arg3: memref<1x10x5xf32, #tpu.memory_space<vmem>>) attributes {dimension_semantics = [#tpu.dimension_semantics<parallel>, #tpu.dimension_semantics<arbitrary>], iteration_bounds = array<i64: 2, 1>, scalar_prefetch = 0 : i64, scratch_operands = 0 : i64, tpu.core_type = #tpu.core_type<tc>, window_params = [{transform_indices = @transform_0, window_bounds = array<i64: 1, 5, 128>}, {transform_indices = @transform_1, window_bounds = array<i64: 1, 10, 5>}]} {
    %c0_i32 = arith.constant 0 : i32
    %0 = arith.cmpi eq, %arg1, %c0_i32 : i32
    %1 = arith.extui %0 : i1 to i32
    %c0_i32_0 = arith.constant 0 : i32
    %2 = arith.cmpi ne, %1, %c0_i32_0 : i32
    scf.if %2 {
      %cst_11 = arith.constant 0.000000e+00 : f32
      %19 = vector.broadcast %cst_11 : f32 to vector<1x10x5xf32>
      %c0_12 = arith.constant 0 : index
      %c0_13 = arith.constant 0 : index
      %c0_14 = arith.constant 0 : index
      %20 = vector.load %arg3[%c0_12, %c0_13, %c0_14] : memref<1x10x5xf32, #tpu.memory_space<vmem>>, vector<1x10x5xf32>
      tpu.vector_store %arg3[%c0_12, %c0_13, %c0_14], %19 {strides = array<i32>} : memref<1x10x5xf32, #tpu.memory_space<vmem>>, vector<1x10x5xf32>,
    } else {
    }
    %c0 = arith.constant 0 : index
    %c0_1 = arith.constant 0 : index
    %c0_2 = arith.constant 0 : index
    %3 = vector.load %arg2[%c0, %c0_1, %c0_2] : memref<1x5x128xf32, #tpu.memory_space<vmem>>, vector<1x5x128xf32>
    %4 = vector.extract_strided_slice %3 {offsets = [0, 0, 0], sizes = [1, 4, 128], strides = [1, 1, 1]} : vector<1x5x128xf32> to vector<1x4x128xf32>
    %5 = vector.extract_strided_slice %3 {offsets = [0, 4, 0], sizes = [1, 1, 128], strides = [1, 1, 1]} : vector<1x5x128xf32> to vector<1x1x128xf32>
    %cst = arith.constant 1.000000e+00 : f32
    %6 = vector.broadcast %cst : f32 to vector<1x1x128xf32>
    %7 = tpu.concatenate %4, %6 in 1 : vector<1x4x128xf32>, vector<1x1x128xf32> -> vector<1x5x128xf32>
    %8 = vector.broadcast %5 : vector<1x1x128xf32> to vector<1x5x128xf32>
    %9 = arith.mulf %7, %8 : vector<1x5x128xf32>
    %cst_3 = arith.constant 1.000000e+00 : f32
    %10 = vector.broadcast %cst_3 : f32 to vector<1x1x128xf32>
    %11 = arith.subf %10, %5 : vector<1x1x128xf32>
    %12 = vector.broadcast %11 : vector<1x1x128xf32> to vector<1x5x128xf32>
    %13 = arith.mulf %7, %12 : vector<1x5x128xf32>
    %14 = tpu.concatenate %9, %13 in 1 : vector<1x5x128xf32>, vector<1x5x128xf32> -> vector<1x10x128xf32>
    %c0_4 = arith.constant 0 : index
    %c0_5 = arith.constant 0 : index
    %c0_6 = arith.constant 0 : index
    %15 = vector.load %arg3[%c0_4, %c0_5, %c0_6] : memref<1x10x5xf32, #tpu.memory_space<vmem>>, vector<1x10x5xf32>
    "tpu.trace_start"() <{level = 10 : i32, message = "brn,bcn->brc"}> : () -> ()
    %cst_7 = arith.constant dense<0.000000e+00> : vector<1x10x5xf32>
    %16 = tpu.matmul %14, %7, %cst_7 {dimension_numbers = #tpu.dot_dimension_numbers<[2], [2], [1], [1], [0, 0, 0, 1, 1, 1], [0], [0]>} : vector<1x10x128xf32>, vector<1x5x128xf32>, vector<1x10x5xf32> -> vector<1x10x5xf32>
    "tpu.trace_stop"() : () -> ()
    %17 = arith.addf %15, %16 : vector<1x10x5xf32>
    %c0_8 = arith.constant 0 : index
    %c0_9 = arith.constant 0 : index
    %c0_10 = arith.constant 0 : index
    %18 = vector.load %arg3[%c0_8, %c0_9, %c0_10] : memref<1x10x5xf32, #tpu.memory_space<vmem>>, vector<1x10x5xf32>
    tpu.vector_store %arg3[%c0_8, %c0_9, %c0_10], %17 {strides = array<i32>} : memref<1x10x5xf32, #tpu.memory_space<vmem>>, vector<1x10x5xf32>,
    return
  }
  func.func @transform_0(%arg0: i32, %arg1: i32) -> (i32, i32, i32) {
    %c0_i32 = arith.constant 0 : i32
    %c0_i32_0 = arith.constant 0 : i32
    return %arg0, %c0_i32, %arg1 : i32, i32, i32
  }
  func.func @transform_1(%arg0: i32, %arg1: i32) -> (i32, i32, i32) {
    %c0_i32 = arith.constant 0 : i32
    %c0_i32_0 = arith.constant 0 : i32
    %c0_i32_1 = arith.constant 0 : i32
    return %arg0, %c0_i32, %c0_i32_0 : i32, i32, i32
  }
}

</mosaic_0001>

<bundles_post_ra>
// kernel: custom-call.15
= control target key start
LH: loop header
LB: loop body
LE: loop exit
PB: predicated region body
PF: predicated region fallthrough
CT: control target
= control target key end

     0   :  { %5 = vsyncpa [#allocation6], 0  ;;  %s935_s0 = inlined_call_operand.vmem [shape: f32[2,4,4], index: 0, kind: input, shape index: {}]   ;;  %s936_s1 = inlined_call_operand.vmem [shape: f32[2,4,4], index: 1, kind: output, shape index: {0}]   ;;  %s937_s2 = inlined_call_operand.hbm [shape: s32[2,4], index: 2, kind: output, shape index: {1}]   ;;  %s938_s3 = inlined_call_operand.hbm [shape: s32[2,4], index: 3, kind: output, shape index: {2}]  }
   0x1   :  { %7 = vsyncpa [#allocation6 + $0x1], 0 }
   0x2   :  { %8 = vsyncpa [#allocation9], 0 }
   0x3   :  { %10 = vsyncpa [#allocation9 + $0x1], 0  ;;  %s746_s12 = smov 0   ;;  %s748_s13 = smov 0  }
   0x4   :  { %s750_s14 = smov 0   ;;  %s752_s15 = smov 0  }
   0x5 LB: > { %s767_s16 = sadd.s32 4294967295, %s717_s15   ;;  %s547_s17 = sadd.s32 4294967294, %s717_s15   ;;  %s717_s15 = sphi %s752_s15, %s949_s15   ;;  %s713_s14 = sphi %s750_s14, %s948_s14   ;;  %s709_s13 = sphi %s748_s13, %s947_s13   ;;  %s705_s12 = sphi %s746_s12, %s946_s12  }
   0x6   : > { %s771_s18 = sadd.s32 1, %s717_s15   ;;  %s20_s19 = sshrl.u32 %s717_s15, 3 }
   0x7   : > { %s21_s20 = sshrl.u32 %s771_s18, 3  ;;  %s25_s21 = sadd.s32 1, %s713_s14 }
   0x8   : > { %s22_s22 = ssub.s32 %s20_s19, %s21_s20  ;;  %p35_p0 = scmp.ne.s32.totalorder %s713_s14, %s709_s13 }
   0x9   : > { %p23_p1 = scmp.eq.s32.totalorder %s22_s22, 0  ;;  %p36_p2 = scmp.eq.s32.totalorder %s767_s16, 1 }
   0xa   : > { %p41_p3 = scmp.ne.s32.totalorder %s709_s13, %s705_s12  ;;  %p42_p4 = scmp.eq.s32.totalorder %s547_s17, 1 }
   0xb   : > { %s782_s23 = scalar_select %p23_p1, %s713_s14, %s25_s21  }
   0xc   : > { %p784_p5 = por %p36_p2, %p35_p0  ;;  %p788_p6 = por %p42_p4, %p41_p3 }
   0xd   : > { %p940_p7 = scmp.ge.s32.totalorder %s717_s15, 2 }
   0xe   : > { %s88_s26 = sand.u32 (!%p940_p7), 1, %s717_s15   ;;  %s551_s27 = sshll.u32 (!%p940_p7), %s717_s15, 2 }
   0xf   : > { %86 = sbr.rel (%p940_p7) target bundleno = 22 (0x16), region = 16  ;;  %s550_s28 = sshll.u32 (!%p940_p7), %s88_s26, 2 }
  0x10   : > { %s92_s4 = scalar_lea.vmem (!%p940_p7), %s935_s0, %s551_s27  ;;  %s90_s5 = scalar_lea.vmem (!%p940_p7), [#allocation1], %s550_s28 }
  0x14   : > { %v109_v0 = vld [vmem:[%s92_s4] sm:$0xf] }
  0x15   : > { %110 = vst [vmem:[%s90_s5] sm:$0xf] %v109_v0 }
  0x16 PF: > { %p552_p8 = scmp.ge.s32.totalorder %s717_s15, 1  ;;  %p127_p9 = scmp.lt.s32.totalorder %s717_s15, 3 }
  0x18   : > { %p128_p10 = pnand %p552_p8, %p127_p9 }
  0x1a   : > { %131 = sbr.rel (%p128_p10) target bundleno = 452 (0x1c4), region = 50 }
  0x1f   : > { %s138_s6 = sand.u32 1, %s767_s16   ;;  %s804_s7 = sand.u32 1, %s709_s13   ;;  %v173_v1 = vlaneseq  ;;  %v723_v4 = vmov 0  }
  0x20   : > { %s806_s8 = sshll.u32 %s138_s6, 2  ;;  %s555_s9 = sshll.u32 %s804_s7, 1 }
  0x21   : > { %v810_v2 = vshrl.u32 %v173_v1, 7  ;;  %s140_s10 = scalar_lea.vmem [#allocation1], %s806_s8  ;;  %s168_s11 = sand.u32 7, %s767_s16  }
  0x22   : > { %v162_v3 = vld [vmem:[%s140_s10] sm:$0xf]  ;;  %s815_s17 = scalar_lea.vmem [#allocation4], %s168_s11  ;;  %s939_s19 = scalar_lea.vmem [#allocation3], %s806_s8 }
  0x23   : > { %163 = vst [vmem:[#allocation0] sm:$0xf] %v162_v3  ;;  %177 = vst [vmem:[#allocation10] sm:$0xff] %v810_v2  ;;  %s819_s20 = scalar_lea.vmem [#allocation5], %s555_s9  ;;  %s821_s21 = scalar_lea.vmem [#allocation8], %s555_s9 }
  0x24   : > { %172 = vst [vmem:[%s815_s17] sm:$0x1] %v723_v4  ;;  %s823_s22 = scalar_lea.vmem [#allocation7], %s168_s11  ;;  %s825_s26 = smov 0  }
  0x2a   : > { %v166_v5 = vld [vmem:[#allocation0] sm:$0xff] }
  0x2b   : > { %167 = vst [vmem:[#allocation2] sm:$0xff] %v166_v5 }
  0x2c LB: >> { %vm193_vm0 = vcmp.lt.s32.totalorder %v810_v2, 4  ;;  %v832_v8 = vstv %s721_s26  ;;  %s234_s27 = ssub.s32 128, %s721_s26  ;;  %v240_v38 = vand.u32 127, %v173_v1  ;;  %v243_v40 = vld [vmem:[%s815_s17] ss:$0 sm:$0xff]  ;;  %s246_s28 = scalar_lea.vmem [#allocation2], %s721_s26  ;;  %s721_s26 = sphi %s825_s26, %s183_s26  }
  0x2d   : >> { %vm192_vm1 = vcmp.ge.s32.totalorder %v810_v2, %v832_v8  ;;  %s252_s30 = scalar_lea.vmem [#allocation10], %s721_s26  ;;  %vm272_vm15 = vcmp.gt.s32.totalorder %v810_v2, %v832_v8  ;;  %s183_s26 = sadd.s32 1, %s721_s26  }
  0x2e   : >> { %vm194_vm3 = vmand %vm192_vm1, %vm193_vm0  ;;  %vm264_vm12 = vcmp.gt.s32.totalorder %v240_v38, %v832_v8  ;;  %vm241_vm13 = vcmp.eq.s32.totalorder %v240_v38, %v832_v8  ;;  %v254_v42 = vld [vmem:[%s252_s30] ss:$0 sm:$0xff]  ;;  %p180_p11 = scmp.ge.s32.totalorder %s183_s26, 4  }
  0x2f   : >> { %vm276_vm1 = vmand %vm272_vm15, %vm241_vm13  ;;  %s408_s6 = sshrl.u32 (%p180_p11), %s767_s16, 3 }
  0x30   : > { %s864_s10 = sshll.u32 (%p180_p11), %s408_s6, 5 }
  0x31   : > { %s413_s26 = scalar_lea.hbm (%p180_p11), %s937_s2, %s864_s10 }
  0x32   : >> { %v188_v6 = vld [vmem:[#allocation2] sm:$0xff]  ;;  %v248_v41 = vld [vmem:[%s246_s28] ss:$0 sm:$0xff] }
  0x33   : >> { %v189_v7 = vand.u32 2147483647, %v188_v6 }
  0x35   : >> { %vm557_vm2 = vcmp.gt.f32.partialorder %v189_v7, -inf }
  0x36   : >> { %vm196_vm4 = vmand %vm194_vm3, %vm557_vm2 }
  0x37   : >> { %v197_v9 = vsel %vm196_vm4, %v810_v2, %v832_v8  ;;  %v198_v10 = vsel %vm196_vm4, %v189_v7, -inf }
  0x38   : >> { %v199_v11 = vrot.slane %v198_v10, 1  ;;  %v200_v12 = vrot.slane %v197_v9, 1 }
  0x3a   : >> { %vm201_vm5 = vcmp.ge.f32.partialorder %v199_v11, %v198_v10  ;;  %v204_v13 = vrot.slane %v199_v11, 1  ;;  %v205_v14 = vrot.slane %v200_v12, 1 }
  0x3b   : >> { %v202_v15 = vsel %vm201_vm5, %v199_v11, %v198_v10  ;;  %v203_v16 = vsel %vm201_vm5, %v200_v12, %v197_v9 }
  0x3c   : >> { %vm206_vm6 = vcmp.ge.f32.partialorder %v204_v13, %v202_v15  ;;  %v209_v17 = vrot.slane %v204_v13, 1  ;;  %v210_v18 = vrot.slane %v205_v14, 1 }
  0x3d   : >> { %v207_v19 = vsel %vm206_vm6, %v204_v13, %v202_v15  ;;  %v208_v20 = vsel %vm206_vm6, %v205_v14, %v203_v16 }
  0x3e   : >> { %vm211_vm7 = vcmp.ge.f32.partialorder %v209_v17, %v207_v19  ;;  %v214_v21 = vrot.slane %v209_v17, 1  ;;  %v215_v22 = vrot.slane %v210_v18, 1 }
  0x3f   : >> { %v212_v23 = vsel %vm211_vm7, %v209_v17, %v207_v19  ;;  %v213_v24 = vsel %vm211_vm7, %v210_v18, %v208_v20 }
  0x40   : >> { %vm216_vm8 = vcmp.ge.f32.partialorder %v214_v21, %v212_v23  ;;  %v219_v25 = vrot.slane %v214_v21, 1  ;;  %v220_v26 = vrot.slane %v215_v22, 1 }
  0x41   : >> { %v217_v27 = vsel %vm216_vm8, %v214_v21, %v212_v23  ;;  %v218_v28 = vsel %vm216_vm8, %v215_v22, %v213_v24 }
  0x42   : >> { %vm221_vm9 = vcmp.ge.f32.partialorder %v219_v25, %v217_v27  ;;  %v224_v29 = vrot.slane %v219_v25, 1  ;;  %v225_v30 = vrot.slane %v220_v26, 1 }
  0x43   : >> { %v222_v31 = vsel %vm221_vm9, %v219_v25, %v217_v27  ;;  %v223_v32 = vsel %vm221_vm9, %v220_v26, %v218_v28 }
  0x44   : >> { %vm226_vm10 = vcmp.ge.f32.partialorder %v224_v29, %v222_v31  ;;  %v229_v33 = vrot.slane %v224_v29, 1  ;;  %v230_v34 = vrot.slane %v225_v30, 1 }
  0x45   : >> { %v227_v35 = vsel %vm226_vm10, %v224_v29, %v222_v31  ;;  %v228_v36 = vsel %vm226_vm10, %v225_v30, %v223_v32 }
  0x46   : >> { %vm231_vm11 = vcmp.ge.f32.partialorder %v229_v33, %v227_v35 }
  0x47   : >> { %v233_v37 = vsel %vm231_vm11, %v230_v34, %v228_v36 }
  0x48   : >> { %235 = vrot.lane.b32.xlu0 %v233_v37, %s234_s27  ;;  %s415_s27 = sshll.u32 (%p180_p11), %s819_s20, 4  ;;  %s416_s27 = int_to_ptr.vmem [resolvable:$true] %s415_s27 }
  0xba   : >> { %v236_v39 = vpop.permute.xlu0 %235 }
  0xbb   : >> { %566 = vpush %v236_v39 }
  0xec   : >> { %s567_s29 = spop %566 }
  0xed   : >> { %v242_v43 = vstv %s567_s29  ;;  %s247_s4 = scalar_lea.vmem [#allocation2], %s567_s29  ;;  %s253_s5 = scalar_lea.vmem [#allocation10], %s567_s29 }
  0xee   : >> { %v249_v44 = vld [vmem:[%s247_s4] ss:$0 sm:$0xff]  ;;  %v244_v46 = vsel %vm241_vm13, %v242_v43, %v243_v40  ;;  %s623_s29 = scalar_lea.vmem (%p180_p11), %s416_s27, 32 }
  0xef   : >> { %v255_v45 = vld [vmem:[%s253_s5] ss:$0 sm:$0xff]  ;;  %250 = vst [vmem:[%s247_s4] sm:$0x1] %v248_v41  ;;  %vm258_vm14 = vcmp.ne.f32.partialorder %v249_v44, 0.0  ;;  %245 = vst [vmem:[%s815_s17] sm:$0x1] %v244_v46  ;;  %v265_v53 = vsel %vm264_vm12, %v249_v44, 0.0  ;;  %p624_p12 = scmp.ne.s32.totalorder (%p180_p11), %s416_s27, %s623_s29 }
  0xf0   : >> { %256 = vst [vmem:[%s253_s5] sm:$0x1] %v254_v42  ;;  %251 = vst [vmem:[%s246_s28] sm:$0x1] %v249_v44  ;;  %s361_s28 = scalar_lea.sflag (%p180_p11), [#allocation6], %s804_s7 }
  0xf1   : >> { %257 = vst [vmem:[%s252_s30] sm:$0x1] %v255_v45  ;;  %vm259_vm0 = vmand %vm241_vm13, %vm258_vm14  ;;  %p625_p13 = pnand (%p180_p11), %p624_p12, %p784_p5  ;;  %s724_s30 = smov (%p180_p11), [#allocation5]  }
  0xf2   : >> { %v260_v47 = vsel %vm259_vm0, %v249_v44, 1.0  ;;  %s627_s4 = sshll.u32 (%p180_p11), %s724_s30, 4  ;;  %s628_s4 = int_to_ptr.vmem [resolvable:$false] %s627_s4 }
  0xf3   : >> { %v273_v48 = vsel %vm272_vm15, %v260_v47, 1.0  ;;  %p626_p0 = pneg (%p180_p11), %p625_p13  ;;  %s629_s5 = scalar_lea.vmem (%p180_p11), %s628_s4, 64 }
  0xf4   : >> { %621 = vrcp.f32 %v273_v48  ;;  %p630_p1 = scmp.lt.s32.totalorder (%p180_p11), %s416_s27, %s628_s4  ;;  %p631_p2 = scmp.lt.s32.totalorder (%p180_p11), %s629_s5, %s623_s29 }
  0xf6   : > { %v344_v59 = vld [vmem:[#allocation4] sm:$0x3] (%p180_p11)  ;;  %p632_p3 = por (%p180_p11), %p631_p2, %p630_p1 }
  0xf7   : >> { %v269_v50 = vld [vmem:[#allocation2] sm:$0xff]  ;;  %347 = vst [vmem:[%s819_s20] sm:$0x3] (%p180_p11), %v344_v59 }
  0xf8   : > { %v283_v57 = vld [vmem:[#allocation10] sm:$0xff] (%p180_p11)  ;;  %p633_p4 = pnand (%p180_p11), %p632_p3, %p626_p0 }
 0x101   : >> { %v622_v49 = vpop.eup %621 }
 0x102   : >> { %v275_v51 = vmul.f32 %v622_v49, %v269_v50 }
 0x104   : >> { %v277_v52 = vsel %vm276_vm1, %v275_v51, 0.0 }
 0x105   : >> { %278 = vadd.xlane.f32.xlu0 %v277_v52 }
 0x132   : > { %299 = vxpose.xlu0.b32.start.end [1/1] (short) (narrow) (%p180_p11), %v283_v57, 8 }
 0x18e   : >> { %v279_v54 = vpop.xlane.xlu0 %278 }
 0x18f   : >> { %v280_v55 = vmul.f32 %v279_v54, %v265_v53  ;;  %182 = sbr.rel (!%p180_p11) target bundleno = 44 (0x2c), region = 173 }
 0x191   : >> { %v281_v56 = vsub.f32 %v275_v51, %v280_v55 }
 0x193   : >> { %282 = vst [vmem:[#allocation2] sm:$0xff] %v281_v56 }
 0x19a   : > { %v336_v58 = vld [vmem:[#allocation2] sm:$0xf] }
 0x19b   : > { %339 = vst [vmem:[%s939_s19] sm:$0xf] %v336_v58 }
 0x19c   : > { %636 = shalt.err (!%p633_p4)
}
 0x19d   : > { %s637_s6 = scalar_lea.hbm %s413_s26, 32  ;;  %s641_s17 = scalar_lea.hbm %s937_s2, 32 }
 0x19e   : > { %p638_p8 = scmp.ne.s32.totalorder %s413_s26, %s637_s6  ;;  %p642_p11 = scmp.lt.s32.totalorder %s413_s26, %s937_s2 }
 0x19f   : > { %p643_p12 = scmp.lt.s32.totalorder %s641_s17, %s637_s6 }
 0x1a0   : > { %p639_p9 = pnand %p638_p8, %p784_p5 }
 0x1a1   : > { %p644_p13 = por %p643_p12, %p642_p11 }
 0x1a2   : > { %p640_p10 = pneg %p639_p9 }
 0x1a4   : > { %p645_p7 = pnand %p644_p13, %p640_p10 }
 0x1a6   : > { %648 = shalt.err (!%p645_p7)
}
 0x1a7   : > { %568 = dma.vmem_to_hbm [thread:$0]  (%p784_p5), %s416_s27, 32, %s413_s26, %s361_s28  }
 0x1a8   : > { %s943_s29 = sshll.u32 %s767_s16, 2  ;;  %s944_s9 = scalar_lea.vmem [#allocation3], %s806_s8 }
 0x1a9   : > { %s371_s19 = scalar_lea.vmem %s936_s1, %s943_s29  ;;  %v388_v60 = vld [vmem:[%s944_s9] sm:$0xf]  ;;  %s429_s5 = sshll.u32 %s821_s21, 4  ;;  %s430_s5 = int_to_ptr.vmem [resolvable:$true] %s429_s5 }
 0x1aa   : > { %389 = vst [vmem:[%s371_s19] sm:$0xf] %v388_v60  ;;  %s897_s11 = scalar_lea.hbm %s938_s3, %s864_s10  ;;  %s366_s26 = scalar_lea.sflag [#allocation9], %s804_s7 }
 0x1ab   : > { %s649_s16 = scalar_lea.vmem %s430_s5, 32  ;;  %s725_s8 = smov [#allocation8]  }
 0x1ac   : > { %p650_p7 = scmp.ne.s32.totalorder %s430_s5, %s649_s16  ;;  %s653_s27 = sshll.u32 %s725_s8, 4  ;;  %s654_s27 = int_to_ptr.vmem [resolvable:$false] %s653_s27 }
 0x1ad   : > { %s655_s28 = scalar_lea.vmem %s654_s27, 64  ;;  %p656_p2 = scmp.lt.s32.totalorder %s430_s5, %s654_s27 }
 0x1ae   : > { %v315_v61 = vpop.trf.xlu0  ;;  %p651_p0 = pnand %p650_p7, %p784_p5  ;;  %p657_p3 = scmp.lt.s32.totalorder %s655_s28, %s649_s16 }
 0x1af   : > { %331 = vst [vmem:[%s823_s22] sm:$0x1] %v315_v61 }
 0x1b0   : > { %p652_p1 = pneg %p651_p0  ;;  %p658_p4 = por %p657_p3, %p656_p2 }
 0x1b2   : > { %p659_p8 = pnand %p658_p4, %p652_p1 }
 0x1b6   : > { %v352_v62 = vld [vmem:[#allocation7] sm:$0x3] }
 0x1b7   : > { %355 = vst [vmem:[%s821_s21] sm:$0x3] %v352_v62 }
 0x1b8   : > { %662 = shalt.err (!%p659_p8)
}
 0x1b9   : > { %s663_s21 = scalar_lea.hbm %s897_s11, 32  ;;  %s667_s10 = scalar_lea.hbm %s938_s3, 32 }
 0x1ba   : > { %p664_p9 = scmp.ne.s32.totalorder %s897_s11, %s663_s21  ;;  %p668_p12 = scmp.lt.s32.totalorder %s897_s11, %s938_s3 }
 0x1bb   : > { %p669_p13 = scmp.lt.s32.totalorder %s667_s10, %s663_s21 }
 0x1bc   : > { %p665_p10 = pnand %p664_p9, %p784_p5 }
 0x1bd   : > { %p670_p7 = por %p669_p13, %p668_p12 }
 0x1be   : > { %p666_p11 = pneg %p665_p10 }
 0x1c0   : > { %p671_p0 = pnand %p670_p7, %p666_p11 }
 0x1c2   : > { %674 = shalt.err (!%p671_p0)
}
 0x1c3   : > { %569 = dma.vmem_to_hbm [thread:$0]  (%p784_p5), %s430_s5, 32, %s897_s11, %s366_s26  }
 0x1c4 PF: > { %s445_s30 = sand.u32 1, %s705_s12   ;;  %p945_p1 = scmp.ge.s32.totalorder %s717_s15, 2 }
 0x1c5   : > { %s446_s4 = scalar_lea.sflag [#allocation6], %s445_s30 }
 0x1c6   : > { %p573_p2 = pnand %p945_p1, %p788_p6 }
 0x1c8   : > { %p574_p3 = pneg %p573_p2 }
 0x1ca   : > { %696 = dma.done.wait (%p574_p3), %s446_s4, 32  }
 0x1cb   : > { %698 = vsyncadd (%p574_p3), %s446_s4, 4294967264  ;;  %s455_s19 = scalar_lea.sflag [#allocation9], %s445_s30 }
 0x1cc   : > { %700 = dma.done.wait (%p574_p3), %s455_s19, 32  }
 0x1cd   : > { %702 = vsyncadd (%p574_p3), %s455_s19, 4294967264  ;;  %p13_p5 = scmp.ge.s32.totalorder %s771_s18, 4   ;;  %s946_s12 = smov %s709_s13 }
 0x1ce   : > { %s947_s13 = smov %s713_s14  ;;  %s948_s14 = smov %s782_s23 }
 0x1cf   : > { %s949_s15 = smov %s771_s18  ;;  %15 = sbr.rel (!%p13_p5) target bundleno = 5 (0x5), region = 184 }
 0x1d4   :  { %460 = vsyncpa [#allocation6], 1 }
 0x1d5   :  { %462 = vsyncpa [#allocation6 + $0x1], 1 }
 0x1d6   :  { %463 = vsyncpa [#allocation9], 1 }
 0x1d7   :  { %465 = vsyncpa [#allocation9 + $0x1], 1 }

// kernel: custom-call.11
= control target key start
LH: loop header
LB: loop body
LE: loop exit
PB: predicated region body
PF: predicated region fallthrough
CT: control target
= control target key end

     0   :  { %5 = vsyncpa [#allocation6], 0  ;;  %s549_s0 = inlined_call_operand.vmem [shape: f32[4,4], index: 0, kind: input, shape index: {}]   ;;  %s550_s1 = inlined_call_operand.vmem [shape: f32[4,4], index: 1, kind: output, shape index: {0}]   ;;  %s551_s2 = inlined_call_operand.hbm [shape: s32[4], index: 2, kind: output, shape index: {1}]   ;;  %s552_s3 = inlined_call_operand.hbm [shape: s32[4], index: 3, kind: output, shape index: {2}]  }
   0x1   :  { %6 = vsyncpa [#allocation9], 0  ;;  %v68_v0 = vld [vmem:[%s549_s0] sm:$0xf]  ;;  %v78_v1 = vlaneseq  ;;  %v478_v2 = vmov 0   ;;  %s508_s14 = smov 0  }
   0x2   :  { %69 = vst [vmem:[#allocation1] sm:$0xf] %v68_v0  ;;  %77 = vst [vmem:[#allocation4] sm:$0x1] %v478_v2 }
   0x3   :  { %v505_v3 = vshrl.u32 %v78_v1, 7 }
   0x5   :  { %82 = vst [vmem:[#allocation10] sm:$0xff] %v505_v3 }
   0x9   :  { %v73_v4 = vld [vmem:[#allocation1] sm:$0xf] }
   0xa   :  { %74 = vst [vmem:[#allocation0] sm:$0xf] %v73_v4 }
  0x11   :  { %v75_v5 = vld [vmem:[#allocation0] sm:$0xff] }
  0x12   :  { %76 = vst [vmem:[#allocation2] sm:$0xff] %v75_v5 }
  0x13 LB: > { %vm98_vm0 = vcmp.lt.s32.totalorder %v505_v3, 4  ;;  %v515_v8 = vstv %s476_s14  ;;  %s139_s0 = ssub.s32 128, %s476_s14  ;;  %v145_v38 = vand.u32 127, %v78_v1  ;;  %v148_v40 = vld [vmem:[#allocation4] ss:$0 sm:$0xff]  ;;  %s151_s15 = scalar_lea.vmem [#allocation2], %s476_s14  ;;  %s476_s14 = sphi %s508_s14, %s88_s14  }
  0x14   : > { %vm97_vm1 = vcmp.ge.s32.totalorder %v505_v3, %v515_v8  ;;  %s157_s17 = scalar_lea.vmem [#allocation10], %s476_s14  ;;  %vm177_vm15 = vcmp.gt.s32.totalorder %v505_v3, %v515_v8  ;;  %s88_s14 = sadd.s32 1, %s476_s14  }
  0x15   : > { %vm99_vm3 = vmand %vm97_vm1, %vm98_vm0  ;;  %vm169_vm12 = vcmp.gt.s32.totalorder %v145_v38, %v515_v8  ;;  %vm146_vm13 = vcmp.eq.s32.totalorder %v145_v38, %v515_v8  ;;  %v159_v42 = vld [vmem:[%s157_s17] ss:$0 sm:$0xff]  ;;  %p85_p0 = scmp.ge.s32.totalorder %s88_s14, 4  }
  0x16   : > { %vm181_vm1 = vmand %vm177_vm15, %vm146_vm13  ;;  %s479_s20 = smov (%p85_p0), [#allocation5]  }
  0x17   :  { %s329_s21 = sshll.u32 (%p85_p0), %s479_s20, 4  ;;  %s330_s21 = int_to_ptr.vmem [resolvable:$true] %s329_s21 }
  0x18   :  { %s426_s22 = scalar_lea.vmem (%p85_p0), %s330_s21, 16  ;;  %s430_s23 = scalar_lea.vmem (%p85_p0), %s330_s21, 32 }
  0x19   : > { %v93_v6 = vld [vmem:[#allocation2] sm:$0xff]  ;;  %v153_v41 = vld [vmem:[%s151_s15] ss:$0 sm:$0xff]  ;;  %p427_p1 = scmp.ne.s32.totalorder (%p85_p0), %s330_s21, %s426_s22  ;;  %p431_p2 = scmp.lt.s32.totalorder (%p85_p0), %s330_s21, %s330_s21 }
  0x1a   : > { %v94_v7 = vand.u32 2147483647, %v93_v6  ;;  %p432_p3 = scmp.lt.s32.totalorder (%p85_p0), %s430_s23, %s426_s22 }
  0x1c   : > { %vm407_vm2 = vcmp.gt.f32.partialorder %v94_v7, -inf  ;;  %p433_p4 = por (%p85_p0), %p432_p3, %p431_p2 }
  0x1d   : > { %vm101_vm4 = vmand %vm99_vm3, %vm407_vm2 }
  0x1e   : > { %v102_v9 = vsel %vm101_vm4, %v505_v3, %v515_v8  ;;  %v103_v10 = vsel %vm101_vm4, %v94_v7, -inf  ;;  %p434_p5 = pnand (%p85_p0), %p433_p4, %p427_p1 }
  0x1f   : > { %v104_v11 = vrot.slane %v103_v10, 1  ;;  %v105_v12 = vrot.slane %v102_v9, 1 }
  0x21   : > { %vm106_vm5 = vcmp.ge.f32.partialorder %v104_v11, %v103_v10  ;;  %v109_v13 = vrot.slane %v104_v11, 1  ;;  %v110_v14 = vrot.slane %v105_v12, 1 }
  0x22   : > { %v107_v15 = vsel %vm106_vm5, %v104_v11, %v103_v10  ;;  %v108_v16 = vsel %vm106_vm5, %v105_v12, %v102_v9 }
  0x23   : > { %vm111_vm6 = vcmp.ge.f32.partialorder %v109_v13, %v107_v15  ;;  %v114_v17 = vrot.slane %v109_v13, 1  ;;  %v115_v18 = vrot.slane %v110_v14, 1 }
  0x24   : > { %v112_v19 = vsel %vm111_vm6, %v109_v13, %v107_v15  ;;  %v113_v20 = vsel %vm111_vm6, %v110_v14, %v108_v16 }
  0x25   : > { %vm116_vm7 = vcmp.ge.f32.partialorder %v114_v17, %v112_v19  ;;  %v119_v21 = vrot.slane %v114_v17, 1  ;;  %v120_v22 = vrot.slane %v115_v18, 1 }
  0x26   : > { %v117_v23 = vsel %vm116_vm7, %v114_v17, %v112_v19  ;;  %v118_v24 = vsel %vm116_vm7, %v115_v18, %v113_v20 }
  0x27   : > { %vm121_vm8 = vcmp.ge.f32.partialorder %v119_v21, %v117_v23  ;;  %v124_v25 = vrot.slane %v119_v21, 1  ;;  %v125_v26 = vrot.slane %v120_v22, 1 }
  0x28   : > { %v122_v27 = vsel %vm121_vm8, %v119_v21, %v117_v23  ;;  %v123_v28 = vsel %vm121_vm8, %v120_v22, %v118_v24 }
  0x29   : > { %vm126_vm9 = vcmp.ge.f32.partialorder %v124_v25, %v122_v27  ;;  %v129_v29 = vrot.slane %v124_v25, 1  ;;  %v130_v30 = vrot.slane %v125_v26, 1 }
  0x2a   : > { %v127_v31 = vsel %vm126_vm9, %v124_v25, %v122_v27  ;;  %v128_v32 = vsel %vm126_vm9, %v125_v26, %v123_v28 }
  0x2b   : > { %vm131_vm10 = vcmp.ge.f32.partialorder %v129_v29, %v127_v31  ;;  %v134_v33 = vrot.slane %v129_v29, 1  ;;  %v135_v34 = vrot.slane %v130_v30, 1 }
  0x2c   : > { %v132_v35 = vsel %vm131_vm10, %v129_v29, %v127_v31  ;;  %v133_v36 = vsel %vm131_vm10, %v130_v30, %v128_v32 }
  0x2d   : > { %vm136_vm11 = vcmp.ge.f32.partialorder %v134_v33, %v132_v35 }
  0x2e   : > { %v138_v37 = vsel %vm136_vm11, %v135_v34, %v133_v36 }
  0x2f   : > { %140 = vrot.lane.b32.xlu0 %v138_v37, %s139_s0 }
  0xa1   : > { %v141_v39 = vpop.permute.xlu0 %140 }
  0xa2   : > { %411 = vpush %v141_v39 }
  0xd3   : > { %s412_s16 = spop %411 }
  0xd4   : > { %v147_v43 = vstv %s412_s16  ;;  %s152_s18 = scalar_lea.vmem [#allocation2], %s412_s16  ;;  %s158_s19 = scalar_lea.vmem [#allocation10], %s412_s16 }
  0xd5   : > { %v154_v44 = vld [vmem:[%s152_s18] ss:$0 sm:$0xff]  ;;  %v149_v46 = vsel %vm146_vm13, %v147_v43, %v148_v40 }
  0xd6   : > { %v160_v45 = vld [vmem:[%s158_s19] ss:$0 sm:$0xff]  ;;  %155 = vst [vmem:[%s152_s18] sm:$0x1] %v153_v41  ;;  %vm163_vm14 = vcmp.ne.f32.partialorder %v154_v44, 0.0  ;;  %150 = vst [vmem:[#allocation4] sm:$0x1] %v149_v46 }
  0xd7   : > { %161 = vst [vmem:[%s158_s19] sm:$0x1] %v159_v42  ;;  %156 = vst [vmem:[%s151_s15] sm:$0x1] %v154_v44  ;;  %v170_v53 = vsel %vm169_vm12, %v154_v44, 0.0 }
  0xd8   : > { %162 = vst [vmem:[%s157_s17] sm:$0x1] %v160_v45  ;;  %vm164_vm0 = vmand %vm146_vm13, %vm163_vm14 }
  0xd9   : > { %v165_v47 = vsel %vm164_vm0, %v154_v44, 1.0 }
  0xda   : > { %v178_v48 = vsel %vm177_vm15, %v165_v47, 1.0 }
  0xdb   : > { %424 = vrcp.f32 %v178_v48 }
  0xdd   :  { %v249_v59 = vld [vmem:[#allocation4] sm:$0x1] (%p85_p0) }
  0xde   : > { %v174_v50 = vld [vmem:[#allocation2] sm:$0xff]  ;;  %252 = vst [vmem:[#allocation5] sm:$0x1] (%p85_p0), %v249_v59 }
  0xdf   :  { %v188_v57 = vld [vmem:[#allocation10] sm:$0xff] (%p85_p0) }
  0xe8   : > { %v425_v49 = vpop.eup %424 }
  0xe9   : > { %v180_v51 = vmul.f32 %v425_v49, %v174_v50 }
  0xeb   : > { %v182_v52 = vsel %vm181_vm1, %v180_v51, 0.0 }
  0xec   : > { %183 = vadd.xlane.f32.xlu0 %v182_v52 }
 0x119   :  { %204 = vxpose.xlu0.b32.start.end [1/1] (short) (narrow) (%p85_p0), %v188_v57, 8 }
 0x175   : > { %v184_v54 = vpop.xlane.xlu0 %183 }
 0x176   : > { %v185_v55 = vmul.f32 %v184_v54, %v170_v53  ;;  %87 = sbr.rel (!%p85_p0) target bundleno = 19 (0x13), region = 134 }
 0x178   : > { %v186_v56 = vsub.f32 %v180_v51, %v185_v55 }
 0x17a   : > { %187 = vst [vmem:[#allocation2] sm:$0xff] %v186_v56 }
 0x181   :  { %v241_v58 = vld [vmem:[#allocation2] sm:$0xf] }
 0x182   :  { %244 = vst [vmem:[#allocation3] sm:$0xf] %v241_v58 }
 0x183   :  { %437 = shalt.err (!%p434_p5)
}
 0x184   :  { %332 = dma.vmem_to_hbm [thread:$0]  %s330_s21, 16, %s551_s2, [#allocation6]  }
 0x185   :  { %s480_s28 = smov [#allocation8]  }
 0x186   :  { %s338_s29 = sshll.u32 %s480_s28, 4  ;;  %s339_s29 = int_to_ptr.vmem [resolvable:$true] %s338_s29 }
 0x187   :  { %s446_s30 = scalar_lea.vmem %s339_s29, 16  ;;  %s450_s4 = scalar_lea.vmem %s339_s29, 32 }
 0x188   :  { %p447_p6 = scmp.ne.s32.totalorder %s339_s29, %s446_s30  ;;  %p451_p7 = scmp.lt.s32.totalorder %s339_s29, %s339_s29 }
 0x189   :  { %v322_v60 = vld [vmem:[#allocation3] sm:$0xf]  ;;  %p452_p8 = scmp.lt.s32.totalorder %s450_s4, %s446_s30 }
 0x18a   :  { %323 = vst [vmem:[%s550_s1] sm:$0xf] %v322_v60 }
 0x18b   :  { %p453_p9 = por %p452_p8, %p451_p7 }
 0x18d   :  { %p454_p10 = pnand %p453_p9, %p447_p6 }
 0x195   :  { %v220_v61 = vpop.trf.xlu0 }
 0x196   :  { %236 = vst [vmem:[#allocation7] sm:$0x1] %v220_v61 }
 0x19d   :  { %v257_v62 = vld [vmem:[#allocation7] sm:$0x1] }
 0x19e   :  { %260 = vst [vmem:[#allocation8] sm:$0x1] %v257_v62 }
 0x19f   :  { %457 = shalt.err (!%p454_p10)
}
 0x1a0   :  { %341 = dma.vmem_to_hbm [thread:$0]  %s339_s29, 16, %s552_s3, [#allocation9]  }
 0x1a1   :  { %470 = dma.done.wait [#allocation6], 16  }
 0x1a2   :  { %471 = vsyncadd [#allocation6], 4294967280 }
 0x1a3   :  { %472 = dma.done.wait [#allocation9], 16  }
 0x1a4   :  { %473 = vsyncadd [#allocation9], 4294967280 }
 0x1a5   :  { %348 = vsyncpa [#allocation6], 1 }
 0x1a6   :  { %349 = vsyncpa [#allocation9], 1 }

// kernel: hastings_ratio_loss.1
= control target key start
LH: loop header
LB: loop body
LE: loop exit
PB: predicated region body
PF: predicated region fallthrough
CT: control target
= control target key end

     0   :  { %s392_s6 = smov 0   ;;  %s394_s7 = smov 0   ;;  %s427_s0 = inlined_call_operand.vmem [shape: f32[2,5,128], index: 0, kind: input, shape index: {}]   ;;  %s428_s1 = inlined_call_operand.vmem [shape: f32[2,10,5], index: 1, kind: output, shape index: {}]  }
   0x1   :  { %s396_s8 = smov 0  }
   0x2 LB: > { %s23_s9 = sadd.s32 1, %s375_s7  ;;  %p317_p0 = scmp.ge.s32.totalorder %s379_s8, 1  ;;  %s379_s8 = sphi %s396_s8, %s11_s8   ;;  %s375_s7 = sphi %s394_s7, %s430_s7   ;;  %s371_s6 = sphi %s392_s6, %s429_s6  }
   0x3   : > { %p25_p1 = scmp.ge.s32.totalorder %s23_s9, 2  ;;  %p103_p2 = scmp.lt.s32.totalorder %s379_s8, 3 }
   0x5   : > { %s432_s9 = smov (%p25_p1, %s23_s9), 0  ;;  %p104_p3 = pnand %p317_p0, %p103_p2 }
   0x6   : > { %p125_p4 = scmp.lt.s32.totalorder (!%p104_p3), %s371_s6, 1 }
   0x7   : > { %107 = sbr.rel (%p104_p3) target bundleno = 224 (0xe0), region = 24 }
   0xc   : > { %v148_v0 = vlaneseq  ;;  %s434_s6 = smov (!%p125_p4, %s371_s6), 1  ;;  %vm143_vm0 = vcmask 33792   ;;  %vm146_vm1 = vcmask 1043456   ;;  %v381_v4 = vmov 0.0  }
   0xd   : > { %s318_s10 = sshll.u32 %s434_s6, 3  ;;  %s323_s11 = sshll.u32 %s434_s6, 4  ;;  %vm162_vm2 = vcmask 1044480   ;;  %vm141_vm3 = vcmask 39936  }
   0xe   : > { %v149_v1 = vshrl.u32 %v148_v0, 7  ;;  %s131_s14 = scalar_lea.vmem %s427_s0, %s318_s10  ;;  %s136_s17 = scalar_lea.vmem %s428_s1, %s323_s11 }
   0xf   : > { %v145_v3 = vld [vmem:[%s131_s14] sm:$0x1f]  ;;  %144 = vst.msk [vmem:[%s136_s17 + $0x8] sm:$0x3] %vm143_vm0, %v381_v4 }
  0x10   : > { %v150_v2 = vsub.s32 4, %v149_v1  ;;  %v147_v5 = vsel %vm146_vm1, %v145_v3, 1.0  ;;  %v153_v6 = vsub.f32 1.0, %v145_v3  ;;  %142 = vst.msk [vmem:[%s136_s17] sm:$0xff] %vm141_vm3, %v381_v4 }
  0x11   : > { %327 = vmatprep.subr.mxu0 %v147_v5 }
  0x12   : > { %v151_v7 = vrot.slane %v145_v3, %v150_v2  ;;  %328 = vmatpush3.xpose.msra.mxu0 %v147_v5  ;;  %v157_v8 = vrot.slane %v153_v6, %v150_v2 }
  0x14   : > { %v152_v9 = vmul.f32 %v151_v7, %v147_v5  ;;  %v158_v10 = vmul.f32 %v157_v8, %v147_v5 }
  0x16   : > { %v160_v11 = vrot.slane %v158_v10, 3  ;;  %v165_v13 = vld [vmem:[%s136_s17 + $0x8] sm:$0x3] }
  0x17   : > { %v164_v15 = vld [vmem:[%s136_s17] sm:$0xff] }
  0x18   : > { %v163_v12 = vsel %vm162_vm2, %v152_v9, %v160_v11 }
  0x19   : > { %329 = vmatprep.mubr.f32.mxu0 %v163_v12 }
  0x1a   : > { %330 = vmatmul.mubr.f32.vlgmr.msra.gmra.mxu0 %v160_v11 }
  0xda   : > { %v331_v14 = vpop.f32.mrf.mxu0 }
  0xdb   : > { %v242_v16 = vadd.f32 %v331_v14, %v165_v13 }
  0xdc   : > { %v232_v17 = vpop.f32.mrf.mxu0 }
  0xdd   : > { %246 = vst.msk [vmem:[%s136_s17 + $0x8] sm:$0x3] %vm143_vm0, %v242_v16  ;;  %v241_v18 = vadd.f32 %v232_v17, %v164_v15 }
  0xdf   : > { %244 = vst.msk [vmem:[%s136_s17] sm:$0xff] %vm141_vm3, %v241_v18 }
  0xe0 PF: > { %s11_s8 = sadd.s32 1, %s379_s8   ;;  %s429_s6 = smov %s375_s7 }
  0xe1   : > { %p8_p5 = scmp.ge.s32.totalorder %s11_s8, 4   ;;  %s430_s7 = smov %s432_s9 }
  0xe3   :  { %10 = sbr.rel (!%p8_p5) target bundleno = 2 (0x2), region = 58 }

</bundles_post_ra>
